<compile_context>
chip_gen: v5e
topology: v5e:2x2
jax: 0.10.0
libtpu: 0.0.40
codegen_flags: <defaults>
</compile_context>

<pallas_src>
import math
import functools

import jax
import jax.numpy as jnp
from jax.experimental import pallas as pl
from jax.experimental.pallas import tpu as pltpu


def _kan_kernel(x_ref, w_ref, extras_ref, out_ref, *, scale_base):
    # x:      (tb, in)      w: (in, out)  (bf16 or f32)
    # extras: (2, out)      row 0 = bias, row 1 = spline_vec * scale_spline
    x = x_ref[...]
    w = w_ref[...]
    # Cast x to the weight dtype per-tile (VPU) so the MXU runs at native bf16
    # rate when the bf16 path is enabled; accumulate in f32 either way.
    acc = jnp.dot(x.astype(w.dtype), w, preferred_element_type=jnp.float32)
    z = acc + extras_ref[0:1, :]                       # bias add (f32)
    base = (z * jax.nn.sigmoid(z)) * scale_base        # SiLU * scale_base (f32)
    out_ref[...] = (base + extras_ref[1:2, :]).astype(out_ref.dtype)


def fold_kan_params(params, *, grid_size, spline_order, grid_range, scale_spline,
                    use_bf16_matmul=True):
    """Parameter-only algebra, computed ONCE per parameter set (not per forward)."""
    u, v, bias, spline_u, spline_v = params
    W = (u @ v)                                                     # (in, out)
    W = W.astype(jnp.bfloat16 if use_bf16_matmul else jnp.float32)
    sf = grid_size + spline_order
    spline_in = jnp.linspace(grid_range[0], grid_range[1], sf, dtype=jnp.float32)
    spline_vec = ((spline_u @ spline_v) @ spline_in) * scale_spline  # (out,)
    extras = jnp.stack([bias.astype(jnp.float32),
                        spline_vec.astype(jnp.float32)], axis=0)     # (2, out)
    return W, extras


_VMEM_TILE_BUDGET = 24 * 1024 * 1024   # conservative: fits v7x's 32 MiB scoped default


def kan_linear_forward(x, folded_params, *, scale_base, block_batch=2048):
    W, extras = folded_params
    B, in_features = x.shape
    out_features = W.shape[1]

    # --- batch tile sizing against a VMEM budget (double-buffered x / out tiles
    #     plus the resident W / extras blocks, which are also double-buffered) ---
    x_row = in_features * x.dtype.itemsize
    out_row = out_features * 4                                       # f32 output
    resident = 2 * W.size * W.dtype.itemsize + 2 * extras.size * 4

    if B <= 8:
        tb = B                                    # full-dim block (always legal)
    else:
        avail = max(_VMEM_TILE_BUDGET - resident, 8 * 2 * (x_row + out_row))
        tb = min(block_batch, avail // (2 * (x_row + out_row)))
        tb = max(8, (tb // 8) * 8)
        tb = min(tb, ((B + 7) // 8) * 8)
        if pl.cdiv(B, tb) == 1:
            # Guarantee >= 2 grid steps so the "parallel" axis actually splits
            # across v7x's two TensorCores.
            tb = max(8, ((pl.cdiv(B, 2) + 7) // 8) * 8)
    grid_steps = pl.cdiv(B, tb)

    need = resident + 2 * tb * (x_row + out_row) + (1 << 20)
    vmem_limit = int(min(max(need * 1.3, 32 * 1024 * 1024), 64 * 1024 * 1024))

    kernel = functools.partial(_kan_kernel, scale_base=scale_base)

    # No batch padding and no output-feature padding: Pallas masks the partial
    # trailing batch block; full-dim feature blocks avoid any pad/slice HBM trips.
    return pl.pallas_call(
        kernel,
        out_shape=jax.ShapeDtypeStruct((B, out_features), jnp.float32),
        grid=(grid_steps,),
        in_specs=[
            pl.BlockSpec((tb, in_features), lambda i: (i, 0)),          # x: streamed
            pl.BlockSpec((in_features, out_features), lambda i: (0, 0)),  # W: resident
            pl.BlockSpec((2, out_features), lambda i: (0, 0)),          # bias+spline
        ],
        out_specs=pl.BlockSpec((tb, out_features), lambda i: (i, 0)),
        compiler_params=pltpu.CompilerParams(
            dimension_semantics=("parallel",),
            vmem_limit_bytes=vmem_limit),
    )(x, W, extras)


def init_kan_params(key, in_features, out_features, grid_size, spline_order,
                    rank, factor_rank):
    """Deterministic synthetic init mirroring the torch shapes / kaiming-style bounds."""
    spline_features = grid_size + spline_order
    k_u, k_v, k_b, k_su, k_sv = jax.random.split(key, 5)

    gain = math.sqrt(2.0 / (1.0 + 5.0))  # kaiming_uniform_ with a=sqrt(5)

    bnd_u = gain * math.sqrt(3.0 / rank)
    u = jax.random.uniform(k_u, (in_features, rank), jnp.float32, -bnd_u, bnd_u)

    bnd_v = gain * math.sqrt(3.0 / out_features)
    v = jax.random.uniform(k_v, (rank, out_features), jnp.float32, -bnd_v, bnd_v)

    bnd_b = 1.0 / math.sqrt(rank)
    bias = jax.random.uniform(k_b, (out_features,), jnp.float32, -bnd_b, bnd_b)

    bnd_su = gain * math.sqrt(3.0 / factor_rank)
    spline_u = jax.random.uniform(k_su, (out_features, factor_rank), jnp.float32,
                                  -bnd_su, bnd_su)

    bnd_sv = gain * math.sqrt(3.0 / spline_features)
    spline_v = jax.random.uniform(k_sv, (factor_rank, spline_features), jnp.float32,
                                  -bnd_sv, bnd_sv)

    return u, v, bias, spline_u, spline_v


def kan_linear_reference(x, params, *, grid_size, spline_order, grid_range,
                         scale_base, scale_spline):
    """Pure-JAX f32 reference matching the torch forward (eval mode)."""
    u, v, bias, spline_u, spline_v = params
    base = x @ (u @ v) + bias
    base = jax.nn.silu(base) * scale_base
    spline_in = jnp.linspace(grid_range[0], grid_range[1],
                             grid_size + spline_order, dtype=jnp.float32)
    spline_w = spline_u @ spline_v                       # (out, spline_features)
    spline_out = jnp.tile(spline_in[None, :], (x.shape[0], 1)) @ spline_w.T
    return base + spline_out * scale_spline


if __name__ == "__main__":
    # Module defaults: grid_size=3, spline_order=1, rank=10, factor_rank=5,
    # scale_base=1.0, scale_spline=1.0, grid_range=[-1, 1], share_spline_weights=True
    B, in_features, out_features = 20, 32, 64
    grid_size, spline_order = 3, 1
    rank, factor_rank = 10, 5
    grid_range = (-1.0, 1.0)
    scale_base, scale_spline = 1.0, 1.0

    key = jax.random.PRNGKey(0)
    k_x, k_p = jax.random.split(key)
    x = jax.random.normal(k_x, (B, in_features), dtype=jnp.float32)
    params = init_kan_params(k_p, in_features, out_features,
                             grid_size, spline_order, rank, factor_rank)

    ref = kan_linear_reference(x, params,
                               grid_size=grid_size, spline_order=spline_order,
                               grid_range=grid_range,
                               scale_base=scale_base, scale_spline=scale_spline)

    # --- f32 MXU path: tight tolerance vs the f32 reference.
    # Default block_batch -> tb=16, 2 grid steps, partial trailing block (B=20).
    folded_f32 = fold_kan_params(params, grid_size=grid_size, spline_order=spline_order,
                                 grid_range=grid_range, scale_spline=scale_spline,
                                 use_bf16_matmul=False)
    out_f32 = kan_linear_forward(x, folded_f32, scale_base=scale_base)
    out_f32 = jax.block_until_ready(out_f32)
    assert out_f32.shape == (B, out_features), out_f32.shape
    assert jnp.allclose(out_f32, ref, atol=1e-5, rtol=1e-5), "f32 path mismatch vs reference"

    # --- bf16 MXU path (default perf path): looser tolerance (bf16 inputs, f32 accum).
    # Small block_batch -> tb=8, 3 grid steps incl. a partial one.
    folded_bf16 = fold_kan_params(params, grid_size=grid_size, spline_order=spline_order,
                                  grid_range=grid_range, scale_spline=scale_spline,
                                  use_bf16_matmul=True)
    out_bf16 = kan_linear_forward(x, folded_bf16, scale_base=scale_base, block_batch=8)
    out_bf16 = jax.block_until_ready(out_bf16)
    assert out_bf16.shape == (B, out_features), out_bf16.shape
    assert jnp.allclose(out_bf16, ref, atol=2e-2, rtol=2e-2), "bf16 path mismatch vs reference"

    print("KERNEL_OK")
</pallas_src>

<mosaic_0001>
module attributes {stable_mosaic.version = 11 : i64} {
  func.func @_kan_kernel(%arg0: i32, %arg1: memref<16x32xf32, #tpu.memory_space<vmem>>, %arg2: memref<32x64xf32, #tpu.memory_space<vmem>>, %arg3: memref<2x64xf32, #tpu.memory_space<vmem>>, %arg4: memref<16x64xf32, #tpu.memory_space<vmem>>) attributes {dimension_semantics = [#tpu.dimension_semantics<parallel>], iteration_bounds = array<i64: 2>, scalar_prefetch = 0 : i64, scratch_operands = 0 : i64, tpu.core_type = #tpu.core_type<tc>, window_params = [{transform_indices = @transform_0, window_bounds = array<i64: 16, 32>}, {pipeline_mode = #tpu.pipeline_mode<synchronous>, transform_indices = @transform_1, window_bounds = array<i64: 32, 64>}, {pipeline_mode = #tpu.pipeline_mode<synchronous>, transform_indices = @transform_2, window_bounds = array<i64: 2, 64>}, {transform_indices = @transform_3, window_bounds = array<i64: 16, 64>}]} {
    %c0 = arith.constant 0 : index
    %c0_0 = arith.constant 0 : index
    %0 = vector.load %arg1[%c0, %c0_0] : memref<16x32xf32, #tpu.memory_space<vmem>>, vector<16x32xf32>
    %c0_1 = arith.constant 0 : index
    %c0_2 = arith.constant 0 : index
    %1 = vector.load %arg2[%c0_1, %c0_2] : memref<32x64xf32, #tpu.memory_space<vmem>>, vector<32x64xf32>
    %cst = arith.constant dense<0.000000e+00> : vector<16x64xf32>
    %2 = tpu.matmul %0, %1, %cst {dimension_numbers = #tpu.dot_dimension_numbers<[1], [0], [0], [1], [0, 0, 1, 1], [], []>} : vector<16x32xf32>, vector<32x64xf32>, vector<16x64xf32> -> vector<16x64xf32>
    %c0_3 = arith.constant 0 : index
    %c0_4 = arith.constant 0 : index
    %3 = vector.load %arg3[%c0_3, %c0_4] : memref<2x64xf32, #tpu.memory_space<vmem>>, vector<1x64xf32>
    %4 = vector.broadcast %3 : vector<1x64xf32> to vector<16x64xf32>
    %5 = arith.addf %2, %4 : vector<16x64xf32>
    %6 = arith.negf %5 : vector<16x64xf32>
    %7 = math.exp %6 : vector<16x64xf32>
    %cst_5 = arith.constant 1.000000e+00 : f32
    %8 = vector.broadcast %cst_5 : f32 to vector<16x64xf32>
    %9 = arith.addf %8, %7 : vector<16x64xf32>
    %10 = arith.divf %8, %9 : vector<16x64xf32>
    %11 = arith.mulf %5, %10 : vector<16x64xf32>
    %cst_6 = arith.constant 1.000000e+00 : f32
    %12 = vector.broadcast %cst_6 : f32 to vector<16x64xf32>
    %13 = arith.mulf %11, %12 : vector<16x64xf32>
    %c1 = arith.constant 1 : index
    %c0_7 = arith.constant 0 : index
    %14 = vector.load %arg3[%c1, %c0_7] : memref<2x64xf32, #tpu.memory_space<vmem>>, vector<1x64xf32>
    %15 = vector.broadcast %14 : vector<1x64xf32> to vector<16x64xf32>
    %16 = arith.addf %13, %15 : vector<16x64xf32>
    %c0_8 = arith.constant 0 : index
    %c0_9 = arith.constant 0 : index
    %17 = vector.load %arg4[%c0_8, %c0_9] : memref<16x64xf32, #tpu.memory_space<vmem>>, vector<16x64xf32>
    tpu.vector_store %arg4[%c0_8, %c0_9], %16 {strides = array<i32>} : memref<16x64xf32, #tpu.memory_space<vmem>>, vector<16x64xf32>,
    return
  }
  func.func @transform_0(%arg0: i32) -> (i32, i32) {
    %c0_i32 = arith.constant 0 : i32
    %c0_i32_0 = arith.constant 0 : i32
    return %arg0, %c0_i32 : i32, i32
  }
  func.func @transform_1(%arg0: i32) -> (i32, i32) {
    %c0_i32 = arith.constant 0 : i32
    %c0_i32_0 = arith.constant 0 : i32
    %c0_i32_1 = arith.constant 0 : i32
    return %c0_i32, %c0_i32_0 : i32, i32
  }
  func.func @transform_2(%arg0: i32) -> (i32, i32) {
    %c0_i32 = arith.constant 0 : i32
    %c0_i32_0 = arith.constant 0 : i32
    %c0_i32_1 = arith.constant 0 : i32
    return %c0_i32, %c0_i32_0 : i32, i32
  }
  func.func @transform_3(%arg0: i32) -> (i32, i32) {
    %c0_i32 = arith.constant 0 : i32
    %c0_i32_0 = arith.constant 0 : i32
    return %arg0, %c0_i32 : i32, i32
  }
}

</mosaic_0001>

<bundles_post_ra>
// kernel: tpu_custom_call.1
= control target key start
LH: loop header
LB: loop body
LE: loop exit
PB: predicated region body
PF: predicated region fallthrough
CT: control target
= control target key end

     0   :  { %8 = vsyncpa [#allocation3], 0  ;;  %s968_s0 = inlined_call_operand.hbm [shape: f32[20,32], index: 0, kind: input, shape index: {}]   ;;  %s969_s1 = inlined_call_operand.hbm [shape: f32[32,64], index: 1, kind: input, shape index: {}]   ;;  %s970_s2 = inlined_call_operand.hbm [shape: f32[2,64], index: 2, kind: input, shape index: {}]   ;;  %s971_s3 = inlined_call_operand.hbm [shape: f32[20,64], index: 3, kind: output, shape index: {}]  }
   0x1   :  { %10 = vsyncpa [#allocation3 + $0x1], 0 }
   0x2   :  { %11 = vsyncpa [#allocation6], 0 }
   0x3   :  { %12 = vsyncpa [#allocation4], 0 }
   0x4   :  { %14 = vsyncpa [#allocation4 + $0x1], 0  ;;  %s763_s12 = smov 0   ;;  %s765_s13 = smov 0  }
   0x5   :  { %s767_s14 = smov 0   ;;  %s769_s15 = smov 0  }
   0x6 LB: > { %s784_s16 = sadd.s32 4294967295, %s731_s15   ;;  %s439_s17 = sadd.s32 4294967294, %s731_s15   ;;  %s731_s15 = sphi %s769_s15, %s988_s15   ;;  %s727_s14 = sphi %s767_s14, %s987_s14   ;;  %s723_s13 = sphi %s765_s13, %s986_s13   ;;  %s719_s12 = sphi %s763_s12, %s985_s12  }
   0x7   : > { %s788_s18 = sadd.s32 1, %s731_s15   ;;  %s27_s19 = sadd.s32 1, %s727_s14 }
   0x8   : > { %s24_s20 = ssub.s32 %s731_s15, %s788_s18  ;;  %p34_p0 = scmp.ne.s32.totalorder %s727_s14, %s723_s13 }
   0x9   : > { %p25_p1 = scmp.eq.s32.totalorder %s24_s20, 0  ;;  %p35_p2 = scmp.eq.s32.totalorder %s731_s15, 0 }
   0xa   : > { %p40_p3 = scmp.ne.s32.totalorder %s723_s13, %s719_s12  ;;  %p973_p4 = scmp.eq.s32.totalorder %s784_s16, 0 }
   0xb   : > { %s800_s21 = scalar_select %p25_p1, %s727_s14, %s27_s19  }
   0xc   : > { %p802_p5 = por %p35_p2, %p34_p0  ;;  %p808_p6 = por %p973_p4, %p40_p3 }
   0xd   : > { %p106_p7 = scmp.eq.s32.totalorder %s784_s16, 1  ;;  %p112_p8 = scmp.eq.s32.totalorder %s439_s17, 1 }
   0xe   : > { %p440_p9 = scmp.ge.s32.totalorder %s731_s15, 1  ;;  %p119_p10 = scmp.lt.s32.totalorder %s731_s15, 3 }
   0xf   : > { %p815_p11 = por %p106_p7, %p34_p0  ;;  %p819_p12 = por %p112_p8, %p40_p3 }
  0x10   : > { %p823_p13 = pnand %p440_p9, %p119_p10  ;;  %s130_s29 = sshll.u32 %s969_s1, 4  ;;  %s131_s29 = int_to_ptr.hbm [resolvable:$true] %s130_s29 }
  0x11   : > { %s977_s25 = scalar_select %p819_p12, 1, 0 }
  0x12   : > { %p485_p1 = pneg %p823_p13  ;;  %s733_s30 = smov [#allocation5]  }
  0x13   : > { %s132_s4 = sshll.u32 %s733_s30, 4  ;;  %s145_s7 = sshll.u32 %s970_s2, 4  ;;  %s133_s4 = int_to_ptr.vmem [resolvable:$true] %s132_s4  ;;  %s146_s7 = int_to_ptr.hbm [resolvable:$true] %s145_s7 }
  0x14   : > { %p486_p0 = pnand %p485_p1, %p973_p4  ;;  %s734_s8 = smov 128  }
  0x15   : > { %s735_s9 = smov 8   ;;  %s736_s10 = smov [#allocation7]  }
  0x16   : > { %488 = dma.hbm_to_vmem [thread:$0]  (!%p486_p0), %s131_s29, 512, %s133_s4, [#allocation6], %s734_s8, %s734_s8, %s735_s9  }
  0x17   : > { %s147_s11 = sshll.u32 %s736_s10, 4  ;;  %p972_p2 = scmp.ge.s32.totalorder %s731_s15, 2  ;;  %s148_s11 = int_to_ptr.vmem [resolvable:$true] %s147_s11 }
  0x18   : > { %491 = dma.hbm_to_vmem [thread:$0]  (!%p486_p0), %s146_s7, 32, %s148_s11, [#allocation6]  }
  0x19   : > { %154 = sbr.rel (%p972_p2) target bundleno = 66 (0x42), region = 24 }
  0x1e   : > { %157 = sbr.rel (!%p802_p5) target bundleno = 66 (0x42), region = 28  ;;  %s158_s17 = sand.u32 (%p802_p5), 1, %s727_s14  }
  0x1f   : > { %s445_s19 = sshll.u32 (%p802_p5), %s731_s15, 1  ;;  %s444_s20 = sshll.u32 (%p802_p5), %s158_s17, 4 }
  0x20   : > { %s164_s27 = ssub.s32 (%p802_p5), 3, %s445_s19  ;;  %s847_s4 = scalar_lea.sflag (%p802_p5), [#allocation3], %s158_s17 }
  0x21   : > { %p165_p3 = scmp.lt.s32.totalorder (%p802_p5), %s164_s27, 2  ;;  %s162_s5 = scalar_lea.vmem (%p802_p5), [#allocation2], %s444_s20 }
  0x23   : > { %s990_s27 = smov (!%p165_p3, %s164_s27), 2 }
  0x24   : > { %s446_s28 = sshll.u32 %s990_s27, 3 }
  0x25   : > { %s168_s29 = ssub.s32 16, %s446_s28 }
  0x26   : > { %s169_s30 = sshll.u32 %s168_s29, 4 }
  0x27   : > { %170 = vsyncadd %s847_s4, %s169_s30  ;;  %p850_p5 = scmp.ne.s32.totalorder %s446_s28, 0  ;;  %s469_s6 = sshll.u32 %s731_s15, 4 }
  0x28   : > { %s173_s9 = scalar_lea.hbm %s968_s0, %s469_s6  ;;  %s858_s10 = sshll.u32 %s162_s5, 4  ;;  %s178_s10 = int_to_ptr.vmem [resolvable:$true] %s858_s10 }
  0x29   : > { %s175_s11 = sshll.u32 %s173_s9, 4  ;;  %s450_s17 = sshll.u32 %s990_s27, 7  ;;  %s861_s11 = int_to_ptr.hbm [resolvable:$true] %s175_s11 }
  0x2a   : > { %s611_s19 = sshra.s32 %s861_s11, 4  ;;  %s613_s20 = sshrl.u32 %s450_s17, 4  ;;  %s612_s19 = int_to_ptr.hbm [resolvable:$true] %s611_s19 }
  0x2b   : > { %s618_s28 = scalar_lea.hbm %s612_s19, %s613_s20  ;;  %s622_s5 = scalar_lea.hbm %s968_s0, 24 }
  0x2c   : > { %p619_p7 = scmp.ne.s32.totalorder %s612_s19, %s618_s28  ;;  %p623_p10 = scmp.lt.s32.totalorder %s612_s19, %s968_s0 }
  0x2d   : > { %p624_p1 = scmp.lt.s32.totalorder %s622_s5, %s618_s28 }
  0x2e   : > { %p620_p8 = pnand %p619_p7, %p850_p5 }
  0x2f   : > { %p625_p0 = por %p624_p1, %p623_p10 }
  0x30   : > { %p621_p9 = pneg %p620_p8 }
  0x32   : > { %p626_p3 = pnand %p625_p0, %p621_p9 }
  0x34   : > { %629 = shalt.err (!%p626_p3)
}
  0x35   : > { %s630_s8 = sshra.s32 %s178_s10, 4  ;;  %s737_s29 = smov [#allocation2]   ;;  %s631_s8 = int_to_ptr.vmem [resolvable:$true] %s630_s8 }
  0x36   : > { %s637_s9 = scalar_lea.vmem %s631_s8, %s613_s20  ;;  %s641_s30 = scalar_lea.vmem %s737_s29, 32 }
  0x37   : > { %p638_p7 = scmp.ne.s32.totalorder %s631_s8, %s637_s9  ;;  %p643_p4 = scmp.lt.s32.totalorder %s641_s30, %s637_s9 }
  0x39   : > { %p639_p8 = pnand %p638_p7, %p850_p5 }
  0x3b   : > { %p640_p2 = pneg %p639_p8 }
  0x3d   : > { %p645_p12 = pnand %p643_p4, %p640_p2 }
  0x3f   : > { %648 = shalt.err (!%p645_p12)
}
  0x40   : > { %s738_s19 = smov 128   ;;  %s739_s28 = smov 8  }
  0x41   : > { %183 = dma.hbm_to_vmem [thread:$0]  (%p850_p5), %s861_s11, %s450_s17, %s178_s10, %s847_s4, %s738_s19, %s738_s19, %s739_s28  }
  0x42 PF: > { %189 = sbr.rel (%p823_p13) target bundleno = 276 (0x114), region = 32  ;;  %s890_s20 = sand.u32 (!%p823_p13), 1, %s723_s13  }
  0x43   : > { %s452_s5 = sshll.u32 (!%p823_p13), %s890_s20, 4  ;;  %s192_s6 = scalar_lea.sflag (!%p823_p13), [#allocation3], %s890_s20 }
  0x44   : > { %s195_s7 = scalar_lea.vmem (!%p823_p13), [#allocation2], %s452_s5 }
  0x47   : > { %706 = dma.done.wait (%p808_p6), %s192_s6, 256  }
  0x48   : > { %708 = vsyncadd (%p808_p6), %s192_s6, 4294967040  ;;  %p980_p4 = scmp.eq.s32.totalorder %s784_s16, 0 }
  0x4a   : > { %710 = dma.done.wait (%p980_p4), [#allocation6], 544   ;;  %p981_p12 = pmov %p980_p4 }
  0x4b   : > { %v244_v0 = vld [vmem:[#allocation5 + $0x18] sm:$0xff]  ;;  %v243_v1 = vld [vmem:[#allocation5 + $0x10] sm:$0xff]  ;;  %v242_v2 = vld [vmem:[#allocation5 + $0x8] sm:$0xff]  ;;  %vm247_vm0 = vcmask 261120   ;;  %vm321_vm9 = vcmask 523264   ;;  %s228_s23 = scalar_lea.vmem [#allocation8], %s452_s5 }
  0x4c   : > { %712 = vsyncadd (%p981_p12), [#allocation6], 4294966752  ;;  %266 = vmatpush.msra.mxu0 %v244_v0  ;;  %471 = vmatpush.msra.mxu1 %v244_v0  ;;  %v241_v3 = vld [vmem:[#allocation5] sm:$0xff]  ;;  %v240_v5 = vld [vmem:[%s195_s7 + $0x8] sm:$0xff]  ;;  %s325_s26 = scalar_lea.sflag [#allocation4], %s890_s20  ;;  %s461_s27 = sshll.u32 (%p815_p11), %s784_s16, 1 }
  0x4d   : > { %v239_v4 = vld [vmem:[%s195_s7] sm:$0xff]  ;;  %s333_s4 = ssub.s32 (%p815_p11), 3, %s461_s27 }
  0x4e   : > { %267 = vmatpush.msra.mxu0 %v243_v1  ;;  %472 = vmatpush.msra.mxu1 %v243_v1  ;;  %v541_v6 = vld [vmem:[#allocation7] ss:$0 sm:$0xff]  ;;  %v542_v33 = vld [vmem:[#allocation7 + $0x1] ss:$0 sm:$0xff]  ;;  %p334_p6 = scmp.lt.s32.totalorder (%p815_p11), %s333_s4, 2 }
  0x50   : > { %268 = vmatpush.msra.mxu0 %v242_v2  ;;  %473 = vmatpush.msra.mxu1 %v242_v2 }
  0x52   : > { %269 = vmatpush.msra.mxu0 %v241_v3  ;;  %474 = vmatpush.msra.mxu1 %v241_v3 }
  0x53   : > { %456 = vmatmul.msk.f32.vlgmr.msra.gmra.mxu0 %vm247_vm0, %v239_v4  ;;  %457 = vmatmul.msk.f32.vlgmr.msra.gmra.mxu1 %vm247_vm0, %v240_v5 }
  0xd0   : > { %v271_v7 = vpop.f32.mrf.mxu0  ;;  %v274_v8 = vpop.f32.mrf.mxu1 }
  0xd1   : > { %v272_v9 = vadd.f32 %v541_v6, %v271_v7  ;;  %v275_v10 = vadd.f32 %v541_v6, %v274_v8 }
  0xd3   : > { %v458_v11 = vmul.f32 -1.442695, %v272_v9  ;;  %v459_v12 = vmul.f32 -1.442695, %v275_v10 }
  0xd5   : > { %543 = vpow2.f32 %v458_v11 }
  0xd6   : > { %545 = vpow2.f32 %v459_v12 }
  0xdb   : > { %v544_v13 = vpop.eup %543 }
  0xdc   : > { %v546_v14 = vpop.eup %545  ;;  %v283_v15 = vadd.f32 1.0, %v544_v13 }
  0xdd   : > { %v284_v16 = vadd.f32 1.0, %v546_v14 }
  0xde   : > { %547 = vrcp.f32 %v283_v15  ;;  %v296_v22 = vand.u32 2147483648, %v283_v15  ;;  %v294_v25 = vand.u32 2147483647, %v283_v15  ;;  %vm290_vm3 = vweird.f32 %v283_v15 }
  0xdf   : > { %549 = vrcp.f32 %v284_v16  ;;  %v311_v26 = vand.u32 2147483648, %v284_v16  ;;  %v309_v28 = vand.u32 2147483647, %v284_v16  ;;  %vm305_vm5 = vweird.f32 %v284_v16 }
  0xe0   : > { %v297_v30 = vor.u32 1.1754944e-38, %v296_v22  ;;  %vm295_vm6 = vcmp.eq.f32.partialorder %v294_v25, 8.507059e+37 }
  0xe1   : > { %v312_v34 = vor.u32 1.1754944e-38, %v311_v26  ;;  %vm310_vm8 = vcmp.eq.f32.partialorder %v309_v28, 8.507059e+37 }
  0xe4   : > { %v548_v17 = vpop.eup %547 }
  0xe5   : > { %v550_v18 = vpop.eup %549  ;;  %v286_v19 = vmul.f32 %v548_v17, %v283_v15  ;;  %vm291_vm1 = vweird.f32 %v548_v17 }
  0xe6   : > { %v301_v20 = vmul.f32 %v550_v18, %v284_v16  ;;  %vm306_vm2 = vweird.f32 %v550_v18  ;;  %vm292_vm4 = vmor %vm290_vm3, %vm291_vm1 }
  0xe7   : > { %v287_v21 = vsub.f32 1.0, %v286_v19  ;;  %vm307_vm7 = vmor %vm305_vm5, %vm306_vm2 }
  0xe8   : > { %v302_v23 = vsub.f32 1.0, %v301_v20 }
  0xe9   : > { %v288_v24 = vmul.f32 %v548_v17, %v287_v21 }
  0xea   : > { %v303_v27 = vmul.f32 %v550_v18, %v302_v23 }
  0xeb   : > { %v289_v29 = vadd.f32 %v548_v17, %v288_v24 }
  0xec   : > { %v304_v31 = vadd.f32 %v550_v18, %v303_v27 }
  0xed   : > { %v293_v32 = vsel %vm292_vm4, %v548_v17, %v289_v29 }
  0xee   : > { %v298_v35 = vsel %vm295_vm6, %v297_v30, %v293_v32  ;;  %v308_v36 = vsel %vm307_vm7, %v550_v18, %v304_v31 }
  0xef   : > { %v315_v37 = vmul.f32 %v298_v35, %v272_v9  ;;  %v313_v38 = vsel %vm310_vm8, %v312_v34, %v308_v36 }
  0xf0   : > { %v316_v39 = vmul.f32 %v313_v38, %v275_v10  ;;  %331 = sbr.rel (!%p815_p11) target bundleno = 276 (0x114), region = 48 }
  0xf1   : > { %v319_v40 = vadd.f32 %v542_v33, %v315_v37 }
  0xf2   : > { %v320_v41 = vadd.f32 %v542_v33, %v316_v39 }
  0xf3   : > { %322 = vst.msk [vmem:[%s228_s23] sm:$0xff] %vm321_vm9, %v319_v40 }
  0xf4   : > { %323 = vst.msk [vmem:[%s228_s23 + $0x8] sm:$0xff] %vm321_vm9, %v320_v41 }
  0xf5   : > { %s992_s4 = smov (!%p334_p6, %s333_s4), 2 }
  0xf6   : > { %s462_s22 = sshll.u32 %s992_s4, 3 }
  0xf7   : > { %s337_s10 = ssub.s32 16, %s462_s22 }
  0xf8   : > { %s338_s11 = sshll.u32 %s337_s10, 4 }
  0xf9   : > { %339 = vsyncadd %s325_s26, %s338_s11  ;;  %p915_p13 = scmp.ne.s32.totalorder %s462_s22, 0  ;;  %s470_s24 = sshll.u32 %s784_s16, 4 }
  0xfa   : > { %s342_s29 = scalar_lea.hbm %s971_s3, %s470_s24  ;;  %s344_s30 = sshll.u32 %s228_s23, 4  ;;  %s923_s30 = int_to_ptr.vmem [resolvable:$true] %s344_s30 }
  0xfb   : > { %s346_s19 = sshll.u32 %s342_s29, 4  ;;  %s466_s28 = sshll.u32 %s992_s4, 7  ;;  %s925_s19 = int_to_ptr.hbm [resolvable:$true] %s346_s19 }
  0xfc   : > { %s650_s5 = sshra.s32 %s923_s30, 4  ;;  %s652_s6 = sshrl.u32 %s466_s28, 4  ;;  %s651_s5 = int_to_ptr.vmem [resolvable:$true] %s650_s5 }
  0xfd   : > { %s657_s7 = scalar_lea.vmem %s651_s5, %s652_s6  ;;  %s740_s16 = smov [#allocation8]  }
  0xfe   : > { %p658_p11 = scmp.ne.s32.totalorder %s651_s5, %s657_s7  ;;  %s661_s27 = scalar_lea.vmem %s740_s16, 32 }
  0xff   : > { %p663_p9 = scmp.lt.s32.totalorder %s661_s27, %s657_s7 }
 0x100   : > { %p659_p2 = pnand %p658_p11, %p915_p13 }
 0x102   : > { %p660_p5 = pneg %p659_p2 }
 0x104   : > { %p665_p10 = pnand %p663_p9, %p660_p5 }
 0x106   : > { %668 = shalt.err (!%p665_p10)
}
 0x107   : > { %s669_s23 = sshra.s32 %s925_s19, 4  ;;  %s680_s24 = scalar_lea.hbm %s971_s3, 24  ;;  %s670_s23 = int_to_ptr.hbm [resolvable:$true] %s669_s23 }
 0x108   : > { %s676_s22 = scalar_lea.hbm %s670_s23, %s652_s6  ;;  %p681_p7 = scmp.lt.s32.totalorder %s670_s23, %s971_s3 }
 0x109   : > { %p677_p1 = scmp.ne.s32.totalorder %s670_s23, %s676_s22  ;;  %p682_p8 = scmp.lt.s32.totalorder %s680_s24, %s676_s22 }
 0x10b   : > { %p678_p0 = pnand %p677_p1, %p915_p13  ;;  %p683_p4 = por %p682_p8, %p681_p7 }
 0x10d   : > { %p679_p3 = pneg %p678_p0 }
 0x10f   : > { %p684_p12 = pnand %p683_p4, %p679_p3 }
 0x111   : > { %687 = shalt.err (!%p684_p12)
}
 0x112   : > { %s741_s29 = smov 128   ;;  %s742_s5 = smov 8  }
 0x113   : > { %352 = dma.vmem_to_hbm [thread:$0]  (%p915_p13), %s923_s30, %s466_s28, %s925_s19, %s325_s26, %s741_s29, %s741_s29, %s742_s5  }
 0x114 PF: > { %s361_s6 = sand.u32 1, %s719_s12   ;;  %p983_p6 = scmp.ne.s32.totalorder %s977_s25, 0 }
 0x115   : > { %p984_p11 = scmp.ge.s32.totalorder %s731_s15, 2  ;;  %s362_s7 = scalar_lea.sflag [#allocation4], %s361_s6 }
 0x117   : > { %p493_p2 = pnand %p984_p11, %p983_p6 }
 0x119   : > { %p494_p5 = pneg %p493_p2 }
 0x11b   : > { %714 = dma.done.wait (%p494_p5), %s362_s7, 256  }
 0x11c   : > { %716 = vsyncadd (%p494_p5), %s362_s7, 4294967040  ;;  %p17_p9 = scmp.ge.s32.totalorder %s788_s18, 4   ;;  %s985_s12 = smov %s723_s13 }
 0x11d   : > { %s986_s13 = smov %s727_s14  ;;  %s987_s14 = smov %s800_s21 }
 0x11e   : > { %s988_s15 = smov %s788_s18  ;;  %19 = sbr.rel (!%p17_p9) target bundleno = 6 (0x6), region = 85 }
 0x123   :  { %368 = vsyncpa [#allocation3], 1 }
 0x124   :  { %370 = vsyncpa [#allocation3 + $0x1], 1 }
 0x125   :  { %371 = vsyncpa [#allocation6], 1 }
 0x126   :  { %372 = vsyncpa [#allocation4], 1 }
 0x127   :  { %374 = vsyncpa [#allocation4 + $0x1], 1 }

</bundles_post_ra>
